<compile_context>
chip_gen: v5e
topology: v5e:2x2
jax: 0.10.0
libtpu: 0.0.40
codegen_flags: <defaults>
</compile_context>

<pallas_src>
import jax
import jax.numpy as jnp
import numpy as np
from jax.experimental import pallas as pl
from jax.experimental.pallas import tpu as pltpu


NEG_SLOPE = 0.01   # F.leaky_relu default
BN_EPS = 1e-5      # nn.BatchNorm1d default


def _glu_kernel(x_ref, w_ref, b_ref, a_ref, c_ref, out_ref):
    od_pad = out_ref.shape[-1]

    # One MXU pass produces both the value and gate halves (f32 accumulation,
    # bf16 operands).
    h = jnp.dot(x_ref[...], w_ref[...], preferred_element_type=jnp.float32)
    h = h + b_ref[...]
    # LeakyReLU: single VPU max instead of cmp+select.
    h = jnp.maximum(h, NEG_SLOPE * h)
    # BatchNorm (running stats folded to a per-feature affine in the wrapper).
    h = h * a_ref[...] + c_ref[...]
    # GLU gate; split lands exactly on a 128-lane boundary (od_pad % 128 == 0).
    out_ref[...] = (h[:, :od_pad] * jax.nn.sigmoid(h[:, od_pad:])).astype(
        out_ref.dtype)


def _round_up(n, m):
    return (n + m - 1) // m * m


def _pad_axis(arr, target, axis):
    pad = target - arr.shape[axis]
    if pad <= 0:
        return arr
    widths = [(0, 0)] * arr.ndim
    widths[axis] = (0, pad)
    return jnp.pad(arr, widths)


def _vmem_cap_bytes():
    """~75% of physical VMEM (64 MiB on v7x, 128 MiB on v5e/v6e)."""
    phys = 64 << 20  # conservative default (v7x)
    try:
        info = pltpu.get_tpu_info()
        phys = int(getattr(info, "vmem_capacity_bytes", phys))
    except Exception:
        pass
    return int(phys * 3 // 4)


def glu_forward(x, params, *, tile_batch=512):
    """Fused GLU forward (eval mode). x: (B, inp_dim) float array."""
    B, K = x.shape
    w = params["w"]                        # (2*od, K)  (PyTorch Linear layout)
    b = params["b"]                        # (2*od,)
    two_od = w.shape[0]
    od = two_od // 2

    # Fold BatchNorm running stats into a per-feature affine a*h + c.
    a = params["bn_g"] / jnp.sqrt(params["bn_v"] + BN_EPS)
    c = params["bn_b"] - params["bn_m"] * a

    # Lane-dense feature padding.
    K_pad = _round_up(K, 128)
    od_pad = _round_up(od, 128)
    two_od_pad = 2 * od_pad

    def split_pad_vec(v):
        va, vg = v[:od], v[od:]
        return jnp.concatenate(
            [_pad_axis(va, od_pad, 0), _pad_axis(vg, od_pad, 0)]
        )[None, :].astype(jnp.float32)

    # Split the linear into value/gate halves, pad each to (od_pad, K_pad),
    # re-fuse so a single MXU pass produces both and the GLU split is
    # lane-aligned.  Resident weight stored in bf16.
    wa = _pad_axis(_pad_axis(w[:od, :], od_pad, 0), K_pad, 1)
    wg = _pad_axis(_pad_axis(w[od:, :], od_pad, 0), K_pad, 1)
    w_fused = jnp.concatenate([wa, wg], axis=0).T.astype(jnp.bfloat16)  # (K_pad, 2*od_pad)

    b_fused = split_pad_vec(b)
    a_fused = split_pad_vec(a)
    c_fused = split_pad_vec(c)

    # Batch tiling: multiple of 8; keep >= 2 grid steps when the batch allows
    # so the "parallel" axis can shard across v7x's 2 TensorCores.
    TB = _round_up(max(8, min(tile_batch, _round_up(B, 8))), 8)
    if _round_up(B, 8) <= TB and B >= 16:
        TB = _round_up(-(-B // 2), 8)
    B_pad = _round_up(B, TB)
    grid = (B_pad // TB,)

    # Stream x in bf16; skip the host-side pad pass entirely when aligned.
    x_in = x.astype(jnp.bfloat16)
    if B_pad != B or K_pad != K:
        x_in = _pad_axis(_pad_axis(x_in, B_pad, 0), K_pad, 1)

    # Advisory cost estimate for the XLA scheduler.
    cost = pl.CostEstimate(
        flops=2 * B_pad * K_pad * two_od_pad,
        transcendentals=B_pad * od_pad,
        bytes_accessed=(B_pad * K_pad * 2            # x (bf16)
                        + K_pad * two_od_pad * 2     # fused weight (bf16)
                        + 3 * two_od_pad * 4         # bias / bn affine
                        + B_pad * od_pad * 4))       # out (f32)

    def run(single_buffer_invariants):
        inv_kwargs = {}
        n_w_buf = 2
        if single_buffer_invariants and hasattr(pl, "Buffered"):
            inv_kwargs = dict(pipeline_mode=pl.Buffered(1))
            n_w_buf = 1

        # Real VMEM footprint (+50% headroom), generation-aware cap.
        est = (2 * TB * K_pad * 2                    # x double buffer (bf16)
               + n_w_buf * K_pad * two_od_pad * 2    # resident fused weight
               + n_w_buf * 3 * two_od_pad * 4        # bias / bn scale / shift
               + 2 * TB * od_pad * 4                 # out double buffer (f32)
               + TB * two_od_pad * 4)                # h intermediate (f32)
        vmem_limit = int(min(_vmem_cap_bytes(), max(4 << 20, int(est * 1.5))))

        return pl.pallas_call(
            _glu_kernel,
            out_shape=jax.ShapeDtypeStruct((B_pad, od_pad), jnp.float32),
            grid=grid,
            in_specs=[
                pl.BlockSpec((TB, K_pad), lambda i: (i, 0)),       # x (streamed)
                pl.BlockSpec((K_pad, two_od_pad), lambda i: (0, 0), **inv_kwargs),
                pl.BlockSpec((1, two_od_pad), lambda i: (0, 0), **inv_kwargs),
                pl.BlockSpec((1, two_od_pad), lambda i: (0, 0), **inv_kwargs),
                pl.BlockSpec((1, two_od_pad), lambda i: (0, 0), **inv_kwargs),
            ],
            out_specs=pl.BlockSpec((TB, od_pad), lambda i: (i, 0)),
            compiler_params=pltpu.CompilerParams(
                dimension_semantics=("parallel",),
                vmem_limit_bytes=vmem_limit),
            cost_estimate=cost,
        )(x_in, w_fused, b_fused, a_fused, c_fused)

    # TODO(synk): for very large K / od on v7x (64 MiB VMEM) a K-axis grid with
    # an f32 accumulator scratch would be needed; not required at these sizes.
    try:
        out = run(True)
    except Exception:
        # Fallback for jax versions where pipeline_mode=pl.Buffered(1) on
        # grid-invariant operands is not supported by pallas_call.
        out = run(False)

    return out[:B, :od]


def _reference_forward(x, params):
    """Pure-JAX eval-mode reference (f32)."""
    w, b = params["w"], params["b"]
    od = w.shape[0] // 2
    h = x @ w.T + b
    h = jnp.where(h > 0, h, NEG_SLOPE * h)
    a = params["bn_g"] / jnp.sqrt(params["bn_v"] + BN_EPS)
    c = params["bn_b"] - params["bn_m"] * a
    h = h * a + c
    return h[:, :od] * jax.nn.sigmoid(h[:, od:])


def make_params(key, inp_dim, out_dim):
    ks = jax.random.split(key, 6)
    two_od = 2 * out_dim
    return {
        "w": 0.2 * jax.random.normal(ks[0], (two_od, inp_dim), jnp.float32),
        "b": 0.1 * jax.random.normal(ks[1], (two_od,), jnp.float32),
        "bn_g": jax.random.uniform(ks[2], (two_od,), jnp.float32, 0.8, 1.2),
        "bn_b": 0.1 * jax.random.normal(ks[3], (two_od,), jnp.float32),
        "bn_m": 0.1 * jax.random.normal(ks[4], (two_od,), jnp.float32),
        "bn_v": jax.random.uniform(ks[5], (two_od,), jnp.float32, 0.5, 1.5),
    }


if __name__ == "__main__":
    batch = 8
    inp_dim = 32
    out_dim = 16

    key = jax.random.PRNGKey(0)
    kx, kp = jax.random.split(key)
    x = jax.random.normal(kx, (batch, inp_dim), jnp.float32)
    params = make_params(kp, inp_dim, out_dim)

    y = glu_forward(x, params)
    y = jax.block_until_ready(y)

    y_ref = _reference_forward(x, params)
    # bf16 matmul operands (f32 accumulation): ~1e-2 relative numerics.
    np.testing.assert_allclose(np.asarray(y), np.asarray(y_ref),
                               rtol=2e-2, atol=2e-2)
    assert y.shape == (batch, out_dim)
    print("KERNEL_OK")
</pallas_src>

<mosaic_0001>
module attributes {stable_mosaic.version = 11 : i64} {
  func.func @_glu_kernel(%arg0: i32, %arg1: memref<8x128xbf16, #tpu.memory_space<vmem>>, %arg2: memref<128x256xbf16, #tpu.memory_space<vmem>>, %arg3: memref<1x256xf32, #tpu.memory_space<vmem>>, %arg4: memref<1x256xf32, #tpu.memory_space<vmem>>, %arg5: memref<1x256xf32, #tpu.memory_space<vmem>>, %arg6: memref<8x128xf32, #tpu.memory_space<vmem>>) attributes {dimension_semantics = [#tpu.dimension_semantics<parallel>], iteration_bounds = array<i64: 1>, scalar_prefetch = 0 : i64, scratch_operands = 0 : i64, tpu.core_type = #tpu.core_type<tc>, window_params = [{transform_indices = @transform_0, window_bounds = array<i64: 8, 128>}, {pipeline_mode = #tpu.pipeline_mode<synchronous>, transform_indices = @transform_1, window_bounds = array<i64: 128, 256>}, {pipeline_mode = #tpu.pipeline_mode<synchronous>, transform_indices = @transform_2, window_bounds = array<i64: 1, 256>}, {pipeline_mode = #tpu.pipeline_mode<synchronous>, transform_indices = @transform_3, window_bounds = array<i64: 1, 256>}, {pipeline_mode = #tpu.pipeline_mode<synchronous>, transform_indices = @transform_4, window_bounds = array<i64: 1, 256>}, {transform_indices = @transform_5, window_bounds = array<i64: 8, 128>}]} {
    %c0 = arith.constant 0 : index
    %c0_0 = arith.constant 0 : index
    %0 = vector.load %arg1[%c0, %c0_0] : memref<8x128xbf16, #tpu.memory_space<vmem>>, vector<8x128xbf16>
    %c0_1 = arith.constant 0 : index
    %c0_2 = arith.constant 0 : index
    %1 = vector.load %arg2[%c0_1, %c0_2] : memref<128x256xbf16, #tpu.memory_space<vmem>>, vector<128x256xbf16>
    %cst = arith.constant dense<0.000000e+00> : vector<8x256xf32>
    %2 = tpu.matmul %0, %1, %cst {dimension_numbers = #tpu.dot_dimension_numbers<[1], [0], [0], [1], [0, 0, 1, 1], [], []>} : vector<8x128xbf16>, vector<128x256xbf16>, vector<8x256xf32> -> vector<8x256xf32>
    %c0_3 = arith.constant 0 : index
    %c0_4 = arith.constant 0 : index
    %3 = vector.load %arg3[%c0_3, %c0_4] : memref<1x256xf32, #tpu.memory_space<vmem>>, vector<1x256xf32>
    %4 = vector.broadcast %3 : vector<1x256xf32> to vector<8x256xf32>
    %5 = arith.addf %2, %4 : vector<8x256xf32>
    %cst_5 = arith.constant 0.00999999977 : f32
    %6 = vector.broadcast %cst_5 : f32 to vector<8x256xf32>
    %7 = arith.mulf %6, %5 : vector<8x256xf32>
    %8 = arith.maximumf %5, %7 : vector<8x256xf32>
    %c0_6 = arith.constant 0 : index
    %c0_7 = arith.constant 0 : index
    %9 = vector.load %arg4[%c0_6, %c0_7] : memref<1x256xf32, #tpu.memory_space<vmem>>, vector<1x256xf32>
    %10 = vector.broadcast %9 : vector<1x256xf32> to vector<8x256xf32>
    %11 = arith.mulf %8, %10 : vector<8x256xf32>
    %c0_8 = arith.constant 0 : index
    %c0_9 = arith.constant 0 : index
    %12 = vector.load %arg5[%c0_8, %c0_9] : memref<1x256xf32, #tpu.memory_space<vmem>>, vector<1x256xf32>
    %13 = vector.broadcast %12 : vector<1x256xf32> to vector<8x256xf32>
    %14 = arith.addf %11, %13 : vector<8x256xf32>
    %15 = vector.extract_strided_slice %14 {offsets = [0, 0], sizes = [8, 128], strides = [1, 1]} : vector<8x256xf32> to vector<8x128xf32>
    %16 = vector.extract_strided_slice %14 {offsets = [0, 128], sizes = [8, 128], strides = [1, 1]} : vector<8x256xf32> to vector<8x128xf32>
    %17 = arith.negf %16 : vector<8x128xf32>
    %18 = math.exp %17 : vector<8x128xf32>
    %cst_10 = arith.constant 1.000000e+00 : f32
    %19 = vector.broadcast %cst_10 : f32 to vector<8x128xf32>
    %20 = arith.addf %19, %18 : vector<8x128xf32>
    %21 = arith.divf %19, %20 : vector<8x128xf32>
    %22 = arith.mulf %15, %21 : vector<8x128xf32>
    %c0_11 = arith.constant 0 : index
    %c0_12 = arith.constant 0 : index
    %23 = vector.load %arg6[%c0_11, %c0_12] : memref<8x128xf32, #tpu.memory_space<vmem>>, vector<8x128xf32>
    tpu.vector_store %arg6[%c0_11, %c0_12], %22 {strides = array<i32>} : memref<8x128xf32, #tpu.memory_space<vmem>>, vector<8x128xf32>,
    return
  }
  func.func @transform_0(%arg0: i32) -> (i32, i32) {
    %c0_i32 = arith.constant 0 : i32
    %c0_i32_0 = arith.constant 0 : i32
    return %arg0, %c0_i32 : i32, i32
  }
  func.func @transform_1(%arg0: i32) -> (i32, i32) {
    %c0_i32 = arith.constant 0 : i32
    %c0_i32_0 = arith.constant 0 : i32
    %c0_i32_1 = arith.constant 0 : i32
    return %c0_i32, %c0_i32_0 : i32, i32
  }
  func.func @transform_2(%arg0: i32) -> (i32, i32) {
    %c0_i32 = arith.constant 0 : i32
    %c0_i32_0 = arith.constant 0 : i32
    %c0_i32_1 = arith.constant 0 : i32
    return %c0_i32, %c0_i32_0 : i32, i32
  }
  func.func @transform_3(%arg0: i32) -> (i32, i32) {
    %c0_i32 = arith.constant 0 : i32
    %c0_i32_0 = arith.constant 0 : i32
    %c0_i32_1 = arith.constant 0 : i32
    return %c0_i32, %c0_i32_0 : i32, i32
  }
  func.func @transform_4(%arg0: i32) -> (i32, i32) {
    %c0_i32 = arith.constant 0 : i32
    %c0_i32_0 = arith.constant 0 : i32
    %c0_i32_1 = arith.constant 0 : i32
    return %c0_i32, %c0_i32_0 : i32, i32
  }
  func.func @transform_5(%arg0: i32) -> (i32, i32) {
    %c0_i32 = arith.constant 0 : i32
    %c0_i32_0 = arith.constant 0 : i32
    return %arg0, %c0_i32 : i32, i32
  }
}

module attributes {stable_mosaic.version = 11 : i64} {
  func.func @_glu_kernel(%arg0: i32, %arg1: memref<8x128xbf16, #tpu.memory_space<vmem>>, %arg2: memref<128x256xbf16, #tpu.memory_space<vmem>>, %arg3: memref<1x256xf32, #tpu.memory_space<vmem>>, %arg4: memref<1x256xf32, #tpu.memory_space<vmem>>, %arg5: memref<1x256xf32, #tpu.memory_space<vmem>>, %arg6: memref<8x128xf32, #tpu.memory_space<vmem>>) attributes {dimension_semantics = [#tpu.dimension_semantics<parallel>], iteration_bounds = array<i64: 1>, scalar_prefetch = 0 : i64, scratch_operands = 0 : i64, tpu.core_type = #tpu.core_type<tc>, window_params = [{transform_indices = @transform_0, window_bounds = array<i64: 8, 128>}, {pipeline_mode = #tpu.pipeline_mode<synchronous>, transform_indices = @transform_1, window_bounds = array<i64: 128, 256>}, {pipeline_mode = #tpu.pipeline_mode<synchronous>, transform_indices = @transform_2, window_bounds = array<i64: 1, 256>}, {pipeline_mode = #tpu.pipeline_mode<synchronous>, transform_indices = @transform_3, window_bounds = array<i64: 1, 256>}, {pipeline_mode = #tpu.pipeline_mode<synchronous>, transform_indices = @transform_4, window_bounds = array<i64: 1, 256>}, {transform_indices = @transform_5, window_bounds = array<i64: 8, 128>}]} {
    %c0 = arith.constant 0 : index
    %c0_0 = arith.constant 0 : index
    %0 = vector.load %arg1[%c0, %c0_0] : memref<8x128xbf16, #tpu.memory_space<vmem>>, vector<8x128xbf16>
    %c0_1 = arith.constant 0 : index
    %c0_2 = arith.constant 0 : index
    %1 = vector.load %arg2[%c0_1, %c0_2] : memref<128x256xbf16, #tpu.memory_space<vmem>>, vector<128x256xbf16>
    %cst = arith.constant dense<0.000000e+00> : vector<8x256xf32>
    %2 = tpu.matmul %0, %1, %cst {dimension_numbers = #tpu.dot_dimension_numbers<[1], [0], [0], [1], [0, 0, 1, 1], [], []>} : vector<8x128xbf16>, vector<128x256xbf16>, vector<8x256xf32> -> vector<8x256xf32>
    %c0_3 = arith.constant 0 : index
    %c0_4 = arith.constant 0 : index
    %3 = vector.load %arg3[%c0_3, %c0_4] : memref<1x256xf32, #tpu.memory_space<vmem>>, vector<1x256xf32>
    %4 = vector.broadcast %3 : vector<1x256xf32> to vector<8x256xf32>
    %5 = arith.addf %2, %4 : vector<8x256xf32>
    %cst_5 = arith.constant 0.00999999977 : f32
    %6 = vector.broadcast %cst_5 : f32 to vector<8x256xf32>
    %7 = arith.mulf %6, %5 : vector<8x256xf32>
    %8 = arith.maximumf %5, %7 : vector<8x256xf32>
    %c0_6 = arith.constant 0 : index
    %c0_7 = arith.constant 0 : index
    %9 = vector.load %arg4[%c0_6, %c0_7] : memref<1x256xf32, #tpu.memory_space<vmem>>, vector<1x256xf32>
    %10 = vector.broadcast %9 : vector<1x256xf32> to vector<8x256xf32>
    %11 = arith.mulf %8, %10 : vector<8x256xf32>
    %c0_8 = arith.constant 0 : index
    %c0_9 = arith.constant 0 : index
    %12 = vector.load %arg5[%c0_8, %c0_9] : memref<1x256xf32, #tpu.memory_space<vmem>>, vector<1x256xf32>
    %13 = vector.broadcast %12 : vector<1x256xf32> to vector<8x256xf32>
    %14 = arith.addf %11, %13 : vector<8x256xf32>
    %15 = vector.extract_strided_slice %14 {offsets = [0, 0], sizes = [8, 128], strides = [1, 1]} : vector<8x256xf32> to vector<8x128xf32>
    %16 = vector.extract_strided_slice %14 {offsets = [0, 128], sizes = [8, 128], strides = [1, 1]} : vector<8x256xf32> to vector<8x128xf32>
    %17 = arith.negf %16 : vector<8x128xf32>
    %18 = math.exp %17 : vector<8x128xf32>
    %cst_10 = arith.constant 1.000000e+00 : f32
    %19 = vector.broadcast %cst_10 : f32 to vector<8x128xf32>
    %20 = arith.addf %19, %18 : vector<8x128xf32>
    %21 = arith.divf %19, %20 : vector<8x128xf32>
    %22 = arith.mulf %15, %21 : vector<8x128xf32>
    %c0_11 = arith.constant 0 : index
    %c0_12 = arith.constant 0 : index
    %23 = vector.load %arg6[%c0_11, %c0_12] : memref<8x128xf32, #tpu.memory_space<vmem>>, vector<8x128xf32>
    tpu.vector_store %arg6[%c0_11, %c0_12], %22 {strides = array<i32>} : memref<8x128xf32, #tpu.memory_space<vmem>>, vector<8x128xf32>,
    return
  }
  func.func @transform_0(%arg0: i32) -> (i32, i32) {
    %c0_i32 = arith.constant 0 : i32
    %c0_i32_0 = arith.constant 0 : i32
    return %arg0, %c0_i32 : i32, i32
  }
  func.func @transform_1(%arg0: i32) -> (i32, i32) {
    %c0_i32 = arith.constant 0 : i32
    %c0_i32_0 = arith.constant 0 : i32
    %c0_i32_1 = arith.constant 0 : i32
    return %c0_i32, %c0_i32_0 : i32, i32
  }
  func.func @transform_2(%arg0: i32) -> (i32, i32) {
    %c0_i32 = arith.constant 0 : i32
    %c0_i32_0 = arith.constant 0 : i32
    %c0_i32_1 = arith.constant 0 : i32
    return %c0_i32, %c0_i32_0 : i32, i32
  }
  func.func @transform_3(%arg0: i32) -> (i32, i32) {
    %c0_i32 = arith.constant 0 : i32
    %c0_i32_0 = arith.constant 0 : i32
    %c0_i32_1 = arith.constant 0 : i32
    return %c0_i32, %c0_i32_0 : i32, i32
  }
  func.func @transform_4(%arg0: i32) -> (i32, i32) {
    %c0_i32 = arith.constant 0 : i32
    %c0_i32_0 = arith.constant 0 : i32
    %c0_i32_1 = arith.constant 0 : i32
    return %c0_i32, %c0_i32_0 : i32, i32
  }
  func.func @transform_5(%arg0: i32) -> (i32, i32) {
    %c0_i32 = arith.constant 0 : i32
    %c0_i32_0 = arith.constant 0 : i32
    return %arg0, %c0_i32 : i32, i32
  }
}

</mosaic_0001>

<bundles_post_ra>
// kernel: tpu_custom_call.1
= control target key start
LH: loop header
LB: loop body
LE: loop exit
PB: predicated region body
PF: predicated region fallthrough
CT: control target
= control target key end

     0   :  { %10 = vsyncpa [#allocation3], 0  ;;  %s542_s0 = inlined_call_operand.hbm [shape: bf16[8,128], index: 0, kind: input, shape index: {}]   ;;  %s543_s1 = inlined_call_operand.hbm [shape: bf16[128,256], index: 1, kind: input, shape index: {}]   ;;  %s544_s2 = inlined_call_operand.hbm [shape: f32[1,256], index: 2, kind: input, shape index: {}]   ;;  %s545_s3 = inlined_call_operand.vmem [shape: f32[1,256], index: 3, kind: input, shape index: {}]   ;;  %s546_s4 = inlined_call_operand.hbm [shape: f32[1,256], index: 4, kind: input, shape index: {}]   ;;  %s547_s5 = inlined_call_operand.hbm [shape: f32[8,128], index: 5, kind: output, shape index: {}]  }
   0x1   :  { %11 = vsyncpa [#allocation6], 0 }
   0x2   :  { %12 = vsyncpa [#allocation9], 0  ;;  %s29_s20 = sshll.u32 %s543_s1, 4  ;;  %s30_s20 = int_to_ptr.hbm [resolvable:$true] %s29_s20 }
   0x3   :  { %13 = vsyncpa [#allocation4], 0  ;;  %s487_s21 = smov [#allocation5]   ;;  %s19_s25 = sshll.u32 %s542_s0, 4  ;;  %s20_s25 = int_to_ptr.hbm [resolvable:$true] %s19_s25 }
   0x4   :  { %s31_s22 = sshll.u32 %s487_s21, 4  ;;  %s488_s26 = smov 128   ;;  %s32_s22 = int_to_ptr.vmem [resolvable:$true] %s31_s22 }
   0x5   :  { %s489_s27 = smov 8   ;;  %s490_s28 = smov [#allocation2]  }
   0x6   :  { %37 = dma.hbm_to_vmem [thread:$0]  %s30_s20, 2048, %s32_s22, [#allocation6], %s488_s26, %s488_s26, %s489_s27  }
   0x7   :  { %s21_s29 = sshll.u32 %s490_s28, 4  ;;  %s43_s7 = sshll.u32 %s544_s2, 4  ;;  %s22_s29 = int_to_ptr.vmem [resolvable:$true] %s21_s29  ;;  %s44_s7 = int_to_ptr.hbm [resolvable:$true] %s43_s7 }
   0x8   :  { %24 = dma.hbm_to_vmem [thread:$0]  %s20_s25, 64, %s22_s29, [#allocation3]  }
   0x9   :  { %s56_s9 = sshll.u32 %s546_s4, 4  ;;  %s491_s10 = smov [#allocation7]   ;;  %s57_s9 = int_to_ptr.hbm [resolvable:$true] %s56_s9 }
   0xa   :  { %s45_s11 = sshll.u32 %s491_s10, 4  ;;  %s492_s0 = smov [#allocation8]   ;;  %s46_s11 = int_to_ptr.vmem [resolvable:$true] %s45_s11 }
   0xb   :  { %48 = dma.hbm_to_vmem [thread:$0]  %s44_s7, 32, %s46_s11, [#allocation6]  }
   0xc   :  { %s58_s12 = sshll.u32 %s492_s0, 4  ;;  %s59_s12 = int_to_ptr.vmem [resolvable:$true] %s58_s12 }
   0xd   :  { %61 = dma.hbm_to_vmem [thread:$0]  %s57_s9, 32, %s59_s12, [#allocation9]  }
   0xe   :  { %479 = dma.done.wait [#allocation3], 64  }
   0xf   :  { %480 = vsyncadd [#allocation3], 4294967232 }
  0x10   :  { %481 = dma.done.wait [#allocation6], 2080  }
  0x11   :  { %482 = vsyncadd [#allocation6], 4294965216 }
  0x12   :  { %483 = dma.done.wait [#allocation9], 32  }
  0x13   :  { %484 = vsyncadd [#allocation9], 4294967264  ;;  %v346_v0 = vld [vmem:[#allocation5 + $0x74] sm:$0xf]  ;;  %v327_v1 = vld [vmem:[#allocation5 + $0x78] sm:$0xf0] }
  0x14   :  { %v344_v2 = vld [vmem:[#allocation5 + $0x64] sm:$0xf]  ;;  %v330_v3 = vor.u32 %v346_v0, %v327_v1  ;;  %v319_v4 = vld [vmem:[#allocation5 + $0x68] sm:$0xf0]  ;;  %v325_v6 = vld [vmem:[#allocation5 + $0x70] sm:$0xf] }
  0x15   :  { %v322_v5 = vor.u32 %v344_v2, %v319_v4  ;;  %v347_v7 = vld [vmem:[#allocation5 + $0x74] sm:$0xf0]  ;;  %v342_v8 = vld [vmem:[#allocation5 + $0x54] sm:$0xf]  ;;  %v311_v9 = vld [vmem:[#allocation5 + $0x58] sm:$0xf0] }
  0x16   :  { %194 = vmatpush.bf16.msra.mxu1 %v330_v3  ;;  %v326_v10 = vor.u32 %v347_v7, %v325_v6  ;;  %v317_v11 = vld [vmem:[#allocation5 + $0x60] sm:$0xf]  ;;  %v345_v12 = vld [vmem:[#allocation5 + $0x64] sm:$0xf0]  ;;  %v314_v14 = vor.u32 %v342_v8, %v311_v9  ;;  %v309_v15 = vld [vmem:[#allocation5 + $0x50] sm:$0xf] }
  0x17   :  { %v318_v13 = vor.u32 %v345_v12, %v317_v11  ;;  %v343_v16 = vld [vmem:[#allocation5 + $0x54] sm:$0xf0]  ;;  %v340_v17 = vld [vmem:[#allocation5 + $0x44] sm:$0xf]  ;;  %v303_v18 = vld [vmem:[#allocation5 + $0x48] sm:$0xf0] }
  0x18   :  { %181 = vmatpush.bf16.msra.mxu0 %v326_v10  ;;  %v310_v19 = vor.u32 %v343_v16, %v309_v15  ;;  %v306_v20 = vor.u32 %v340_v17, %v303_v18  ;;  %v301_v21 = vld [vmem:[#allocation5 + $0x40] sm:$0xf]  ;;  %v341_v22 = vld [vmem:[#allocation5 + $0x44] sm:$0xf0]  ;;  %v338_v23 = vld [vmem:[#allocation5 + $0x34] sm:$0xf] }
  0x19   :  { %v295_v24 = vld [vmem:[#allocation5 + $0x38] sm:$0xf0]  ;;  %v302_v25 = vor.u32 %v341_v22, %v301_v21  ;;  %v293_v27 = vld [vmem:[#allocation5 + $0x30] sm:$0xf]  ;;  %v339_v28 = vld [vmem:[#allocation5 + $0x34] sm:$0xf0] }
  0x1a   :  { %195 = vmatpush.bf16.msra.mxu1 %v322_v5  ;;  %v298_v26 = vor.u32 %v338_v23, %v295_v24  ;;  %v336_v29 = vld [vmem:[#allocation5 + $0x24] sm:$0xf]  ;;  %v287_v30 = vld [vmem:[#allocation5 + $0x28] sm:$0xf0]  ;;  %v294_v31 = vor.u32 %v339_v28, %v293_v27  ;;  %v285_v33 = vld [vmem:[#allocation5 + $0x20] sm:$0xf] }
  0x1b   :  { %v290_v32 = vor.u32 %v336_v29, %v287_v30  ;;  %v337_v34 = vld [vmem:[#allocation5 + $0x24] sm:$0xf0]  ;;  %v334_v35 = vld [vmem:[#allocation5 + $0x14] sm:$0xf]  ;;  %v279_v36 = vld [vmem:[#allocation5 + $0x18] sm:$0xf0] }
  0x1c   :  { %182 = vmatpush.bf16.msra.mxu0 %v318_v13  ;;  %v286_v37 = vor.u32 %v337_v34, %v285_v33  ;;  %v282_v38 = vor.u32 %v334_v35, %v279_v36  ;;  %v277_v39 = vld [vmem:[#allocation5 + $0x10] sm:$0xf]  ;;  %v335_v40 = vld [vmem:[#allocation5 + $0x14] sm:$0xf0]  ;;  %v332_v41 = vld [vmem:[#allocation5 + $0x4] sm:$0xf] }
  0x1d   :  { %v271_v42 = vld [vmem:[#allocation5 + $0x8] sm:$0xf0]  ;;  %v278_v43 = vor.u32 %v335_v40, %v277_v39  ;;  %v269_v45 = vld [vmem:[#allocation5] sm:$0xf]  ;;  %v333_v46 = vld [vmem:[#allocation5 + $0x4] sm:$0xf0] }
  0x1e   :  { %196 = vmatpush.bf16.msra.mxu1 %v314_v14  ;;  %v274_v44 = vor.u32 %v332_v41, %v271_v42  ;;  %v270_v47 = vor.u32 %v333_v46, %v269_v45  ;;  %v78_v48 = vld [vmem:[#allocation2] sm:$0xf]  ;;  %v95_v49 = vld [vmem:[#allocation7] sm:$0x3]  ;;  %v219_v54 = vld [vmem:[#allocation8] sm:$0x3] }
  0x1f   :  { %v98_v50 = vperm.slane %v95_v49, 1  ;;  %v211_v52 = vld [vmem:[%s545_s3] sm:$0x3]  ;;  %v222_v59 = vperm.slane %v219_v54, 1  ;;  %v97_v1 = vperm.slane %v95_v49, 0  ;;  %v221_v11 = vperm.slane %v219_v54, 0 }
  0x20   :  { %183 = vmatpush.bf16.msra.mxu0 %v310_v19  ;;  %v214_v56 = vperm.slane %v211_v52, 1  ;;  %v213_v8 = vperm.slane %v211_v52, 0  ;;  %s493_s3 = smov [#allocation10]   ;;  %s255_s16 = sshll.u32 %s547_s5, 4  ;;  %s256_s16 = int_to_ptr.hbm [resolvable:$true] %s255_s16 }
  0x21   :  { %s253_s13 = sshll.u32 %s493_s3, 4  ;;  %s254_s13 = int_to_ptr.vmem [resolvable:$true] %s253_s13 }
  0x22   :  { %197 = vmatpush.bf16.msra.mxu1 %v306_v20 }
  0x24   :  { %184 = vmatpush.bf16.msra.mxu0 %v302_v25 }
  0x26   :  { %198 = vmatpush.bf16.msra.mxu1 %v298_v26 }
  0x28   :  { %185 = vmatpush.bf16.msra.mxu0 %v294_v31 }
  0x2a   :  { %199 = vmatpush.bf16.msra.mxu1 %v290_v32 }
  0x2c   :  { %186 = vmatpush.bf16.msra.mxu0 %v286_v37 }
  0x2e   :  { %200 = vmatpush.bf16.msra.mxu1 %v282_v38 }
  0x30   :  { %187 = vmatpush.bf16.msra.mxu0 %v278_v43 }
  0x32   :  { %201 = vmatpush.bf16.msra.mxu1 %v274_v44 }
  0x34   :  { %188 = vmatpush.bf16.msra.mxu0 %v270_v47 }
  0x35   :  { %202 = vmatmul.bf16.vlgmr.msra.gmra.mxu1 %v78_v48 }
  0x37   :  { %189 = vmatmul.bf16.vlgmr.msra.gmra.mxu0 %v78_v48 }
  0xb2   :  { %v203_v51 = vpop.f32.mrf.mxu1 }
  0xb3   :  { %v204_v53 = vadd.f32 %v203_v51, %v98_v50 }
  0xb4   :  { %v190_v57 = vpop.f32.mrf.mxu0 }
  0xb5   :  { %v208_v55 = vmul.f32 0.01, %v204_v53  ;;  %v191_v4 = vadd.f32 %v190_v57, %v97_v1 }
  0xb7   :  { %v210_v58 = vmax.f32 %v204_v53, %v208_v55  ;;  %v207_v5 = vmul.f32 0.01, %v191_v4 }
  0xb9   :  { %v218_v60 = vmul.f32 %v214_v56, %v210_v58  ;;  %v209_v7 = vmax.f32 %v191_v4, %v207_v5 }
  0xba   :  { %v205_v61 = vpop.f32.mrf.mxu1 }
  0xbb   :  { %v226_v62 = vadd.f32 %v222_v59, %v218_v60  ;;  %v217_v13 = vmul.f32 %v213_v8, %v209_v7 }
  0xbc   :  { %v192_v0 = vpop.f32.mrf.mxu0 }
  0xbd   :  { %v331_v63 = vmul.f32 -1.442695, %v226_v62  ;;  %v225_v18 = vadd.f32 %v221_v11, %v217_v13 }
  0xbf   :  { %355 = vpow2.f32 %v331_v63 }
  0xc5   :  { %v356_v2 = vpop.eup %355 }
  0xc6   :  { %v230_v3 = vadd.f32 1.0, %v356_v2 }
  0xc8   :  { %357 = vrcp.f32 %v230_v3  ;;  %v242_v12 = vand.u32 2147483648, %v230_v3  ;;  %v240_v15 = vand.u32 2147483647, %v230_v3  ;;  %vm236_vm1 = vweird.f32 %v230_v3 }
  0xca   :  { %v243_v17 = vor.u32 1.1754944e-38, %v242_v12  ;;  %vm241_vm3 = vcmp.eq.f32.partialorder %v240_v15, 8.507059e+37 }
  0xce   :  { %v358_v6 = vpop.eup %357 }
  0xcf   :  { %v232_v9 = vmul.f32 %v358_v6, %v230_v3  ;;  %vm237_vm0 = vweird.f32 %v358_v6 }
  0xd0   :  { %vm238_vm2 = vmor %vm236_vm1, %vm237_vm0 }
  0xd1   :  { %v233_v10 = vsub.f32 1.0, %v232_v9 }
  0xd3   :  { %v234_v14 = vmul.f32 %v358_v6, %v233_v10 }
  0xd5   :  { %v235_v16 = vadd.f32 %v358_v6, %v234_v14 }
  0xd7   :  { %v239_v19 = vsel %vm238_vm2, %v358_v6, %v235_v16 }
  0xd8   :  { %v244_v20 = vsel %vm241_vm3, %v243_v17, %v239_v19 }
  0xd9   :  { %v246_v21 = vmul.f32 %v244_v20, %v225_v18 }
  0xdb   :  { %247 = vst [vmem:[#allocation10] sm:$0xff] %v246_v21 }
  0xdc   :  { %258 = dma.vmem_to_hbm [thread:$0]  %s254_s13, 128, %s256_s16, [#allocation4]  }
  0xdd   :  { %485 = dma.done.wait [#allocation4], 128  }
  0xde   :  { %486 = vsyncadd [#allocation4], 4294967168 }
  0xdf   :  { %263 = vsyncpa [#allocation3], 1 }
  0xe0   :  { %264 = vsyncpa [#allocation6], 1 }
  0xe1   :  { %265 = vsyncpa [#allocation9], 1 }
  0xe2   :  { %266 = vsyncpa [#allocation4], 1 }

// kernel: tpu_custom_call.1
= control target key start
LH: loop header
LB: loop body
LE: loop exit
PB: predicated region body
PF: predicated region fallthrough
CT: control target
= control target key end

     0   :  { %10 = vsyncpa [#allocation3], 0  ;;  %s542_s0 = inlined_call_operand.hbm [shape: bf16[8,128], index: 0, kind: input, shape index: {}]   ;;  %s543_s1 = inlined_call_operand.hbm [shape: bf16[128,256], index: 1, kind: input, shape index: {}]   ;;  %s544_s2 = inlined_call_operand.hbm [shape: f32[1,256], index: 2, kind: input, shape index: {}]   ;;  %s545_s3 = inlined_call_operand.vmem [shape: f32[1,256], index: 3, kind: input, shape index: {}]   ;;  %s546_s4 = inlined_call_operand.hbm [shape: f32[1,256], index: 4, kind: input, shape index: {}]   ;;  %s547_s5 = inlined_call_operand.hbm [shape: f32[8,128], index: 5, kind: output, shape index: {}]  }
   0x1   :  { %11 = vsyncpa [#allocation6], 0 }
   0x2   :  { %12 = vsyncpa [#allocation9], 0  ;;  %s29_s20 = sshll.u32 %s543_s1, 4  ;;  %s30_s20 = int_to_ptr.hbm [resolvable:$true] %s29_s20 }
   0x3   :  { %13 = vsyncpa [#allocation4], 0  ;;  %s487_s21 = smov [#allocation5]   ;;  %s19_s25 = sshll.u32 %s542_s0, 4  ;;  %s20_s25 = int_to_ptr.hbm [resolvable:$true] %s19_s25 }
   0x4   :  { %s31_s22 = sshll.u32 %s487_s21, 4  ;;  %s488_s26 = smov 128   ;;  %s32_s22 = int_to_ptr.vmem [resolvable:$true] %s31_s22 }
   0x5   :  { %s489_s27 = smov 8   ;;  %s490_s28 = smov [#allocation2]  }
   0x6   :  { %37 = dma.hbm_to_vmem [thread:$0]  %s30_s20, 2048, %s32_s22, [#allocation6], %s488_s26, %s488_s26, %s489_s27  }
   0x7   :  { %s21_s29 = sshll.u32 %s490_s28, 4  ;;  %s43_s7 = sshll.u32 %s544_s2, 4  ;;  %s22_s29 = int_to_ptr.vmem [resolvable:$true] %s21_s29  ;;  %s44_s7 = int_to_ptr.hbm [resolvable:$true] %s43_s7 }
   0x8   :  { %24 = dma.hbm_to_vmem [thread:$0]  %s20_s25, 64, %s22_s29, [#allocation3]  }
   0x9   :  { %s56_s9 = sshll.u32 %s546_s4, 4  ;;  %s491_s10 = smov [#allocation7]   ;;  %s57_s9 = int_to_ptr.hbm [resolvable:$true] %s56_s9 }
   0xa   :  { %s45_s11 = sshll.u32 %s491_s10, 4  ;;  %s492_s0 = smov [#allocation8]   ;;  %s46_s11 = int_to_ptr.vmem [resolvable:$true] %s45_s11 }
   0xb   :  { %48 = dma.hbm_to_vmem [thread:$0]  %s44_s7, 32, %s46_s11, [#allocation6]  }
   0xc   :  { %s58_s12 = sshll.u32 %s492_s0, 4  ;;  %s59_s12 = int_to_ptr.vmem [resolvable:$true] %s58_s12 }
   0xd   :  { %61 = dma.hbm_to_vmem [thread:$0]  %s57_s9, 32, %s59_s12, [#allocation9]  }
   0xe   :  { %479 = dma.done.wait [#allocation3], 64  }
   0xf   :  { %480 = vsyncadd [#allocation3], 4294967232 }
  0x10   :  { %481 = dma.done.wait [#allocation6], 2080  }
  0x11   :  { %482 = vsyncadd [#allocation6], 4294965216 }
  0x12   :  { %483 = dma.done.wait [#allocation9], 32  }
  0x13   :  { %484 = vsyncadd [#allocation9], 4294967264  ;;  %v346_v0 = vld [vmem:[#allocation5 + $0x74] sm:$0xf]  ;;  %v327_v1 = vld [vmem:[#allocation5 + $0x78] sm:$0xf0] }
  0x14   :  { %v344_v2 = vld [vmem:[#allocation5 + $0x64] sm:$0xf]  ;;  %v330_v3 = vor.u32 %v346_v0, %v327_v1  ;;  %v319_v4 = vld [vmem:[#allocation5 + $0x68] sm:$0xf0]  ;;  %v325_v6 = vld [vmem:[#allocation5 + $0x70] sm:$0xf] }
  0x15   :  { %v322_v5 = vor.u32 %v344_v2, %v319_v4  ;;  %v347_v7 = vld [vmem:[#allocation5 + $0x74] sm:$0xf0]  ;;  %v342_v8 = vld [vmem:[#allocation5 + $0x54] sm:$0xf]  ;;  %v311_v9 = vld [vmem:[#allocation5 + $0x58] sm:$0xf0] }
  0x16   :  { %194 = vmatpush.bf16.msra.mxu1 %v330_v3  ;;  %v326_v10 = vor.u32 %v347_v7, %v325_v6  ;;  %v317_v11 = vld [vmem:[#allocation5 + $0x60] sm:$0xf]  ;;  %v345_v12 = vld [vmem:[#allocation5 + $0x64] sm:$0xf0]  ;;  %v314_v14 = vor.u32 %v342_v8, %v311_v9  ;;  %v309_v15 = vld [vmem:[#allocation5 + $0x50] sm:$0xf] }
  0x17   :  { %v318_v13 = vor.u32 %v345_v12, %v317_v11  ;;  %v343_v16 = vld [vmem:[#allocation5 + $0x54] sm:$0xf0]  ;;  %v340_v17 = vld [vmem:[#allocation5 + $0x44] sm:$0xf]  ;;  %v303_v18 = vld [vmem:[#allocation5 + $0x48] sm:$0xf0] }
  0x18   :  { %181 = vmatpush.bf16.msra.mxu0 %v326_v10  ;;  %v310_v19 = vor.u32 %v343_v16, %v309_v15  ;;  %v306_v20 = vor.u32 %v340_v17, %v303_v18  ;;  %v301_v21 = vld [vmem:[#allocation5 + $0x40] sm:$0xf]  ;;  %v341_v22 = vld [vmem:[#allocation5 + $0x44] sm:$0xf0]  ;;  %v338_v23 = vld [vmem:[#allocation5 + $0x34] sm:$0xf] }
  0x19   :  { %v295_v24 = vld [vmem:[#allocation5 + $0x38] sm:$0xf0]  ;;  %v302_v25 = vor.u32 %v341_v22, %v301_v21  ;;  %v293_v27 = vld [vmem:[#allocation5 + $0x30] sm:$0xf]  ;;  %v339_v28 = vld [vmem:[#allocation5 + $0x34] sm:$0xf0] }
  0x1a   :  { %195 = vmatpush.bf16.msra.mxu1 %v322_v5  ;;  %v298_v26 = vor.u32 %v338_v23, %v295_v24  ;;  %v336_v29 = vld [vmem:[#allocation5 + $0x24] sm:$0xf]  ;;  %v287_v30 = vld [vmem:[#allocation5 + $0x28] sm:$0xf0]  ;;  %v294_v31 = vor.u32 %v339_v28, %v293_v27  ;;  %v285_v33 = vld [vmem:[#allocation5 + $0x20] sm:$0xf] }
  0x1b   :  { %v290_v32 = vor.u32 %v336_v29, %v287_v30  ;;  %v337_v34 = vld [vmem:[#allocation5 + $0x24] sm:$0xf0]  ;;  %v334_v35 = vld [vmem:[#allocation5 + $0x14] sm:$0xf]  ;;  %v279_v36 = vld [vmem:[#allocation5 + $0x18] sm:$0xf0] }
  0x1c   :  { %182 = vmatpush.bf16.msra.mxu0 %v318_v13  ;;  %v286_v37 = vor.u32 %v337_v34, %v285_v33  ;;  %v282_v38 = vor.u32 %v334_v35, %v279_v36  ;;  %v277_v39 = vld [vmem:[#allocation5 + $0x10] sm:$0xf]  ;;  %v335_v40 = vld [vmem:[#allocation5 + $0x14] sm:$0xf0]  ;;  %v332_v41 = vld [vmem:[#allocation5 + $0x4] sm:$0xf] }
  0x1d   :  { %v271_v42 = vld [vmem:[#allocation5 + $0x8] sm:$0xf0]  ;;  %v278_v43 = vor.u32 %v335_v40, %v277_v39  ;;  %v269_v45 = vld [vmem:[#allocation5] sm:$0xf]  ;;  %v333_v46 = vld [vmem:[#allocation5 + $0x4] sm:$0xf0] }
  0x1e   :  { %196 = vmatpush.bf16.msra.mxu1 %v314_v14  ;;  %v274_v44 = vor.u32 %v332_v41, %v271_v42  ;;  %v270_v47 = vor.u32 %v333_v46, %v269_v45  ;;  %v78_v48 = vld [vmem:[#allocation2] sm:$0xf]  ;;  %v95_v49 = vld [vmem:[#allocation7] sm:$0x3]  ;;  %v219_v54 = vld [vmem:[#allocation8] sm:$0x3] }
  0x1f   :  { %v98_v50 = vperm.slane %v95_v49, 1  ;;  %v211_v52 = vld [vmem:[%s545_s3] sm:$0x3]  ;;  %v222_v59 = vperm.slane %v219_v54, 1  ;;  %v97_v1 = vperm.slane %v95_v49, 0  ;;  %v221_v11 = vperm.slane %v219_v54, 0 }
  0x20   :  { %183 = vmatpush.bf16.msra.mxu0 %v310_v19  ;;  %v214_v56 = vperm.slane %v211_v52, 1  ;;  %v213_v8 = vperm.slane %v211_v52, 0  ;;  %s493_s3 = smov [#allocation10]   ;;  %s255_s16 = sshll.u32 %s547_s5, 4  ;;  %s256_s16 = int_to_ptr.hbm [resolvable:$true] %s255_s16 }
  0x21   :  { %s253_s13 = sshll.u32 %s493_s3, 4  ;;  %s254_s13 = int_to_ptr.vmem [resolvable:$true] %s253_s13 }
  0x22   :  { %197 = vmatpush.bf16.msra.mxu1 %v306_v20 }
  0x24   :  { %184 = vmatpush.bf16.msra.mxu0 %v302_v25 }
  0x26   :  { %198 = vmatpush.bf16.msra.mxu1 %v298_v26 }
  0x28   :  { %185 = vmatpush.bf16.msra.mxu0 %v294_v31 }
  0x2a   :  { %199 = vmatpush.bf16.msra.mxu1 %v290_v32 }
  0x2c   :  { %186 = vmatpush.bf16.msra.mxu0 %v286_v37 }
  0x2e   :  { %200 = vmatpush.bf16.msra.mxu1 %v282_v38 }
  0x30   :  { %187 = vmatpush.bf16.msra.mxu0 %v278_v43 }
  0x32   :  { %201 = vmatpush.bf16.msra.mxu1 %v274_v44 }
  0x34   :  { %188 = vmatpush.bf16.msra.mxu0 %v270_v47 }
  0x35   :  { %202 = vmatmul.bf16.vlgmr.msra.gmra.mxu1 %v78_v48 }
  0x37   :  { %189 = vmatmul.bf16.vlgmr.msra.gmra.mxu0 %v78_v48 }
  0xb2   :  { %v203_v51 = vpop.f32.mrf.mxu1 }
  0xb3   :  { %v204_v53 = vadd.f32 %v203_v51, %v98_v50 }
  0xb4   :  { %v190_v57 = vpop.f32.mrf.mxu0 }
  0xb5   :  { %v208_v55 = vmul.f32 0.01, %v204_v53  ;;  %v191_v4 = vadd.f32 %v190_v57, %v97_v1 }
  0xb7   :  { %v210_v58 = vmax.f32 %v204_v53, %v208_v55  ;;  %v207_v5 = vmul.f32 0.01, %v191_v4 }
  0xb9   :  { %v218_v60 = vmul.f32 %v214_v56, %v210_v58  ;;  %v209_v7 = vmax.f32 %v191_v4, %v207_v5 }
  0xba   :  { %v205_v61 = vpop.f32.mrf.mxu1 }
  0xbb   :  { %v226_v62 = vadd.f32 %v222_v59, %v218_v60  ;;  %v217_v13 = vmul.f32 %v213_v8, %v209_v7 }
  0xbc   :  { %v192_v0 = vpop.f32.mrf.mxu0 }
  0xbd   :  { %v331_v63 = vmul.f32 -1.442695, %v226_v62  ;;  %v225_v18 = vadd.f32 %v221_v11, %v217_v13 }
  0xbf   :  { %355 = vpow2.f32 %v331_v63 }
  0xc5   :  { %v356_v2 = vpop.eup %355 }
  0xc6   :  { %v230_v3 = vadd.f32 1.0, %v356_v2 }
  0xc8   :  { %357 = vrcp.f32 %v230_v3  ;;  %v242_v12 = vand.u32 2147483648, %v230_v3  ;;  %v240_v15 = vand.u32 2147483647, %v230_v3  ;;  %vm236_vm1 = vweird.f32 %v230_v3 }
  0xca   :  { %v243_v17 = vor.u32 1.1754944e-38, %v242_v12  ;;  %vm241_vm3 = vcmp.eq.f32.partialorder %v240_v15, 8.507059e+37 }
  0xce   :  { %v358_v6 = vpop.eup %357 }
  0xcf   :  { %v232_v9 = vmul.f32 %v358_v6, %v230_v3  ;;  %vm237_vm0 = vweird.f32 %v358_v6 }
  0xd0   :  { %vm238_vm2 = vmor %vm236_vm1, %vm237_vm0 }
  0xd1   :  { %v233_v10 = vsub.f32 1.0, %v232_v9 }
  0xd3   :  { %v234_v14 = vmul.f32 %v358_v6, %v233_v10 }
  0xd5   :  { %v235_v16 = vadd.f32 %v358_v6, %v234_v14 }
  0xd7   :  { %v239_v19 = vsel %vm238_vm2, %v358_v6, %v235_v16 }
  0xd8   :  { %v244_v20 = vsel %vm241_vm3, %v243_v17, %v239_v19 }
  0xd9   :  { %v246_v21 = vmul.f32 %v244_v20, %v225_v18 }
  0xdb   :  { %247 = vst [vmem:[#allocation10] sm:$0xff] %v246_v21 }
  0xdc   :  { %258 = dma.vmem_to_hbm [thread:$0]  %s254_s13, 128, %s256_s16, [#allocation4]  }
  0xdd   :  { %485 = dma.done.wait [#allocation4], 128  }
  0xde   :  { %486 = vsyncadd [#allocation4], 4294967168 }
  0xdf   :  { %263 = vsyncpa [#allocation3], 1 }
  0xe0   :  { %264 = vsyncpa [#allocation6], 1 }
  0xe1   :  { %265 = vsyncpa [#allocation9], 1 }
  0xe2   :  { %266 = vsyncpa [#allocation4], 1 }

</bundles_post_ra>
